<compile_context>
chip_gen: v7x
topology: tpu7x:2x2x1
jax: 0.10.0
libtpu: 0.0.40
codegen_flags: <defaults>
</compile_context>

<pallas_src>
import math

import jax
import jax.numpy as jnp
from jax.experimental import pallas as pl
from jax.experimental.pallas import tpu as pltpu


# ----------------------------- kernel body ------------------------------------
def _make_mlp_kernel(num_layers, compute_dtype):
    """Fused Linear(+bias) -> ReLU -> ... -> Linear(+bias) over one row tile.

    Ref layout (natural, row-major; rows of the batch on sublanes):
      x_ref : (block_n, d_in)    activation rows for this tile
      w_i   : (d_in_i, d_out_i)  weight, pre-transposed to (in, out)
      b_i   : (1, d_out_i)       bias row, broadcast over the tile rows
      o_ref : (block_n, d_out)   output rows
    """

    def kernel(*refs):
        x_ref = refs[0]
        w_refs = refs[1:1 + num_layers]
        b_refs = refs[1 + num_layers:1 + 2 * num_layers]
        o_ref = refs[-1]

        h = x_ref[...]                                   # (block_n, d_in) f32
        for i in range(num_layers):
            # MXU matmul with f32 accumulation; bias add rides the VPU slot.
            h = (jnp.dot(h.astype(compute_dtype), w_refs[i][...],
                         preferred_element_type=jnp.float32)
                 + b_refs[i][...])
            if i < num_layers - 1:
                h = jnp.maximum(h, 0.0)                  # ReLU on hidden layers
        o_ref[...] = h.astype(o_ref.dtype)

    return kernel


# ----------------------------- wrapper -----------------------------------------
def mlp_forward(x, weights, biases, *, use_bf16_matmul=False):
    """Pallas MLP forward, identical semantics to the PyTorch MLP.

    x:        (..., input_dim) float array.
    weights:  tuple of (out_i, in_i) arrays (PyTorch nn.Linear layout).
    biases:   tuple of (out_i,) arrays.
    Returns   (..., output_dim) float32.
    """
    weights = tuple(weights)
    biases = tuple(biases)
    num_layers = len(weights)
    lead = x.shape[:-1]
    din = x.shape[-1]
    n = int(math.prod(lead)) if lead else 1
    dout = weights[-1].shape[0]
    compute_dtype = jnp.bfloat16 if use_bf16_matmul else jnp.float32
    w_itemsize = 2 if use_bf16_matmul else 4

    # Per-layer weight prep (tiny arrays; the activations are never touched on
    # the host side): (out, in) PyTorch layout -> (in, out) so the kernel does
    # x @ W^T + b with zero in-kernel transposes.  Biases become (1, out) rows.
    w_ts = [w.astype(compute_dtype).T for w in weights]
    b_rows = [b.astype(jnp.float32).reshape(1, -1) for b in biases]

    # Natural-layout input view: metadata-only reshape, no transpose/concat/pad.
    x2 = x.reshape(n, din).astype(jnp.float32)

    # Row tiling: a single full block when small, 1024-row tiles otherwise
    # (per-grid-step overhead ~0.35us; at hidden=32 the live intermediate is
    # ~128 KiB ~= half the vreg file).  A partial last tile (n not a multiple
    # of block_n) is handled by Pallas' masked boundary writes.
    # TODO(synk): for very large hidden dims, tile the per-layer matmul over
    # the weight output rows instead of shrinking block_n.
    block_n = n if n <= 1024 else 1024
    grid_n = pl.cdiv(n, block_n)

    resident = pl.Buffered(1)   # constant index_map -> keep a single VMEM copy
    in_specs = [pl.BlockSpec((block_n, din), lambda i: (i, 0))]
    for w in w_ts:
        in_specs.append(
            pl.BlockSpec(w.shape, lambda i: (0, 0), pipeline_mode=resident))
    for b in b_rows:
        in_specs.append(
            pl.BlockSpec(b.shape, lambda i: (0, 0), pipeline_mode=resident))
    out_specs = pl.BlockSpec((block_n, dout), lambda i: (i, 0))

    # Advisory cost estimate: lets XLA overlap this latency-dominated call.
    flops = 2 * n * sum(int(w.shape[0]) * int(w.shape[1]) for w in weights)
    bytes_accessed = (
        n * din * 4
        + sum(int(w.size) * w_itemsize for w in w_ts)
        + sum(int(b.size) * 4 for b in b_rows)
        + n * dout * 4)

    y = pl.pallas_call(
        _make_mlp_kernel(num_layers, compute_dtype),
        out_shape=jax.ShapeDtypeStruct((n, dout), jnp.float32),
        grid_spec=pltpu.PrefetchScalarGridSpec(
            num_scalar_prefetch=0,
            grid=(grid_n,),
            in_specs=in_specs,
            out_specs=out_specs,
        ),
        compiler_params=pltpu.CompilerParams(
            # Row tiles are independent: let v7x shard them across its 2 TCs;
            # never split a single-step grid.
            dimension_semantics=("parallel",) if grid_n > 1 else ("arbitrary",)),
        cost_estimate=pl.CostEstimate(
            flops=flops, transcendentals=0, bytes_accessed=bytes_accessed),
    )(x2, *w_ts, *b_rows)

    return y.reshape(*lead, dout)


# ---------------- pure-JAX reference (mirrors the PyTorch MLP exactly) --------
def mlp_reference(x, weights, biases):
    h = x.astype(jnp.float32)
    num_layers = len(weights)
    for i, (w, b) in enumerate(zip(weights, biases)):
        h = h @ w.astype(jnp.float32).T + b.astype(jnp.float32)
        if i < num_layers - 1:
            h = jax.nn.relu(h)
    return h


# ---------------- deterministic parameter construction (nn.Linear init) -------
def make_mlp_params(key, input_dim, hidden_dim, output_dim, num_layers):
    dims_in = [input_dim] + [hidden_dim] * (num_layers - 1)
    dims_out = [hidden_dim] * (num_layers - 1) + [output_dim]
    weights, biases = [], []
    for n_in, n_out in zip(dims_in, dims_out):
        key, kw, kb = jax.random.split(key, 3)
        lim = 1.0 / math.sqrt(n_in)
        weights.append(jax.random.uniform(kw, (n_out, n_in), jnp.float32, -lim, lim))
        biases.append(jax.random.uniform(kb, (n_out,), jnp.float32, -lim, lim))
    return tuple(weights), tuple(biases)


# ---------------- main ---------------------------------------------------------
if __name__ == "__main__":
    key = jax.random.PRNGKey(0)
    kx, kp = jax.random.split(key)

    # IDOL toy config: bbox_embed = MLP(hidden=32, hidden=32, out=4, num_layers=3)
    # applied to (batch=2, queries=16, hidden=32) query features.
    B, Q, D, OUT, L = 2, 16, 32, 4, 3
    x = jax.random.normal(kx, (B, Q, D), jnp.float32)
    weights, biases = make_mlp_params(kp, D, D, OUT, L)

    fwd = jax.jit(mlp_forward)

    # Small single-tile case (grid = 1).
    y = jax.block_until_ready(fwd(x, weights, biases))
    y_ref = jax.block_until_ready(mlp_reference(x, weights, biases))
    assert y.shape == (B, Q, OUT), y.shape
    assert bool(jnp.all(jnp.isfinite(y)))
    max_err = float(jnp.max(jnp.abs(y - y_ref)))
    assert max_err < 1e-4, f"max abs err vs reference (small): {max_err}"

    # Multi-tile case (grid = 2, "parallel" row tiles; exercises the v7x path).
    x_big = jax.random.normal(kx, (2, 1024, D), jnp.float32)
    y_big = jax.block_until_ready(fwd(x_big, weights, biases))
    y_big_ref = jax.block_until_ready(mlp_reference(x_big, weights, biases))
    assert y_big.shape == (2, 1024, OUT), y_big.shape
    max_err_big = float(jnp.max(jnp.abs(y_big - y_big_ref)))
    assert max_err_big < 1e-4, f"max abs err vs reference (tiled): {max_err_big}"

    print("KERNEL_OK")
</pallas_src>

<mosaic_0001>
module attributes {stable_mosaic.version = 11 : i64} {
  func.func @kernel(%arg0: i32, %arg1: memref<32x32xf32, #tpu.memory_space<vmem>>, %arg2: memref<32x32xf32, #tpu.memory_space<vmem>>, %arg3: memref<32x32xf32, #tpu.memory_space<vmem>>, %arg4: memref<32x4xf32, #tpu.memory_space<vmem>>, %arg5: memref<1x32xf32, #tpu.memory_space<vmem>>, %arg6: memref<1x32xf32, #tpu.memory_space<vmem>>, %arg7: memref<1x4xf32, #tpu.memory_space<vmem>>, %arg8: memref<32x4xf32, #tpu.memory_space<vmem>>) attributes {dimension_semantics = [#tpu.dimension_semantics<arbitrary>], iteration_bounds = array<i64: 1>, scalar_prefetch = 0 : i64, scratch_operands = 0 : i64, tpu.core_type = #tpu.core_type<tc>, window_params = [{transform_indices = @transform_0, window_bounds = array<i64: 32, 32>}, {pipeline_mode = #tpu.pipeline_mode<synchronous>, transform_indices = @transform_1, window_bounds = array<i64: 32, 32>}, {pipeline_mode = #tpu.pipeline_mode<synchronous>, transform_indices = @transform_2, window_bounds = array<i64: 32, 32>}, {pipeline_mode = #tpu.pipeline_mode<synchronous>, transform_indices = @transform_3, window_bounds = array<i64: 32, 4>}, {pipeline_mode = #tpu.pipeline_mode<synchronous>, transform_indices = @transform_4, window_bounds = array<i64: 1, 32>}, {pipeline_mode = #tpu.pipeline_mode<synchronous>, transform_indices = @transform_5, window_bounds = array<i64: 1, 32>}, {pipeline_mode = #tpu.pipeline_mode<synchronous>, transform_indices = @transform_6, window_bounds = array<i64: 1, 4>}, {transform_indices = @transform_7, window_bounds = array<i64: 32, 4>}]} {
    %c0 = arith.constant 0 : index
    %c0_0 = arith.constant 0 : index
    %0 = vector.load %arg1[%c0, %c0_0] : memref<32x32xf32, #tpu.memory_space<vmem>>, vector<32x32xf32>
    %c0_1 = arith.constant 0 : index
    %c0_2 = arith.constant 0 : index
    %1 = vector.load %arg2[%c0_1, %c0_2] : memref<32x32xf32, #tpu.memory_space<vmem>>, vector<32x32xf32>
    %cst = arith.constant dense<0.000000e+00> : vector<32x32xf32>
    %2 = tpu.matmul %0, %1, %cst {dimension_numbers = #tpu.dot_dimension_numbers<[1], [0], [0], [1], [0, 0, 1, 1], [], []>} : vector<32x32xf32>, vector<32x32xf32>, vector<32x32xf32> -> vector<32x32xf32>
    %c0_3 = arith.constant 0 : index
    %c0_4 = arith.constant 0 : index
    %3 = vector.load %arg5[%c0_3, %c0_4] : memref<1x32xf32, #tpu.memory_space<vmem>>, vector<1x32xf32>
    %4 = vector.broadcast %3 : vector<1x32xf32> to vector<32x32xf32>
    %5 = arith.addf %2, %4 : vector<32x32xf32>
    %cst_5 = arith.constant 0.000000e+00 : f32
    %6 = vector.broadcast %cst_5 : f32 to vector<32x32xf32>
    %7 = arith.maximumf %5, %6 : vector<32x32xf32>
    %c0_6 = arith.constant 0 : index
    %c0_7 = arith.constant 0 : index
    %8 = vector.load %arg3[%c0_6, %c0_7] : memref<32x32xf32, #tpu.memory_space<vmem>>, vector<32x32xf32>
    %cst_8 = arith.constant dense<0.000000e+00> : vector<32x32xf32>
    %9 = tpu.matmul %7, %8, %cst_8 {dimension_numbers = #tpu.dot_dimension_numbers<[1], [0], [0], [1], [0, 0, 1, 1], [], []>} : vector<32x32xf32>, vector<32x32xf32>, vector<32x32xf32> -> vector<32x32xf32>
    %c0_9 = arith.constant 0 : index
    %c0_10 = arith.constant 0 : index
    %10 = vector.load %arg6[%c0_9, %c0_10] : memref<1x32xf32, #tpu.memory_space<vmem>>, vector<1x32xf32>
    %11 = vector.broadcast %10 : vector<1x32xf32> to vector<32x32xf32>
    %12 = arith.addf %9, %11 : vector<32x32xf32>
    %cst_11 = arith.constant 0.000000e+00 : f32
    %13 = vector.broadcast %cst_11 : f32 to vector<32x32xf32>
    %14 = arith.maximumf %12, %13 : vector<32x32xf32>
    %c0_12 = arith.constant 0 : index
    %c0_13 = arith.constant 0 : index
    %15 = vector.load %arg4[%c0_12, %c0_13] : memref<32x4xf32, #tpu.memory_space<vmem>>, vector<32x4xf32>
    %cst_14 = arith.constant dense<0.000000e+00> : vector<32x4xf32>
    %16 = tpu.matmul %14, %15, %cst_14 {dimension_numbers = #tpu.dot_dimension_numbers<[1], [0], [0], [1], [0, 0, 1, 1], [], []>} : vector<32x32xf32>, vector<32x4xf32>, vector<32x4xf32> -> vector<32x4xf32>
    %c0_15 = arith.constant 0 : index
    %c0_16 = arith.constant 0 : index
    %17 = vector.load %arg7[%c0_15, %c0_16] : memref<1x4xf32, #tpu.memory_space<vmem>>, vector<1x4xf32>
    %18 = vector.broadcast %17 : vector<1x4xf32> to vector<32x4xf32>
    %19 = arith.addf %16, %18 : vector<32x4xf32>
    %c0_17 = arith.constant 0 : index
    %c0_18 = arith.constant 0 : index
    %20 = vector.load %arg8[%c0_17, %c0_18] : memref<32x4xf32, #tpu.memory_space<vmem>>, vector<32x4xf32>
    tpu.vector_store %arg8[%c0_17, %c0_18], %19 {strides = array<i32>} : memref<32x4xf32, #tpu.memory_space<vmem>>, vector<32x4xf32>,
    return
  }
  func.func @transform_0(%arg0: i32) -> (i32, i32) {
    %c0_i32 = arith.constant 0 : i32
    %c0_i32_0 = arith.constant 0 : i32
    return %arg0, %c0_i32 : i32, i32
  }
  func.func @transform_1(%arg0: i32) -> (i32, i32) {
    %c0_i32 = arith.constant 0 : i32
    %c0_i32_0 = arith.constant 0 : i32
    %c0_i32_1 = arith.constant 0 : i32
    return %c0_i32, %c0_i32_0 : i32, i32
  }
  func.func @transform_2(%arg0: i32) -> (i32, i32) {
    %c0_i32 = arith.constant 0 : i32
    %c0_i32_0 = arith.constant 0 : i32
    %c0_i32_1 = arith.constant 0 : i32
    return %c0_i32, %c0_i32_0 : i32, i32
  }
  func.func @transform_3(%arg0: i32) -> (i32, i32) {
    %c0_i32 = arith.constant 0 : i32
    %c0_i32_0 = arith.constant 0 : i32
    %c0_i32_1 = arith.constant 0 : i32
    return %c0_i32, %c0_i32_0 : i32, i32
  }
  func.func @transform_4(%arg0: i32) -> (i32, i32) {
    %c0_i32 = arith.constant 0 : i32
    %c0_i32_0 = arith.constant 0 : i32
    %c0_i32_1 = arith.constant 0 : i32
    return %c0_i32, %c0_i32_0 : i32, i32
  }
  func.func @transform_5(%arg0: i32) -> (i32, i32) {
    %c0_i32 = arith.constant 0 : i32
    %c0_i32_0 = arith.constant 0 : i32
    %c0_i32_1 = arith.constant 0 : i32
    return %c0_i32, %c0_i32_0 : i32, i32
  }
  func.func @transform_6(%arg0: i32) -> (i32, i32) {
    %c0_i32 = arith.constant 0 : i32
    %c0_i32_0 = arith.constant 0 : i32
    %c0_i32_1 = arith.constant 0 : i32
    return %c0_i32, %c0_i32_0 : i32, i32
  }
  func.func @transform_7(%arg0: i32) -> (i32, i32) {
    %c0_i32 = arith.constant 0 : i32
    %c0_i32_0 = arith.constant 0 : i32
    return %arg0, %c0_i32 : i32, i32
  }
}

</mosaic_0001>

<bundles_post_ra>
// kernel: mlp_forward.1
= control target key start
LH: loop header
LB: loop body
LE: loop exit
PB: predicated region body
PF: predicated region fallthrough
CT: control target
= control target key end

     0   :  { %vm41_vm0 = vcmask 261120   ;;  %vm363_vm1 = vcmask 31744   ;;  %s602_s1 = inlined_call_operand.vmem [shape: f32[32,32], index: 1, kind: input, shape index: {}]   ;;  %s603_s0 = inlined_call_operand.vmem [shape: f32[32,32], index: 0, kind: input, shape index: {}]   ;;  %s604_s2 = inlined_call_operand.vmem [shape: f32[32,32], index: 2, kind: input, shape index: {}]   ;;  %s605_s3 = inlined_call_operand.vmem [shape: f32[32,4], index: 3, kind: input, shape index: {}]   ;;  %s606_s4 = inlined_call_operand.vmem [shape: f32[1,32], index: 4, kind: input, shape index: {}]   ;;  %s607_s5 = inlined_call_operand.vmem [shape: f32[1,32], index: 5, kind: input, shape index: {}]   ;;  %s608_s6 = inlined_call_operand.vmem [shape: f32[1,4], index: 6, kind: input, shape index: {}]   ;;  %s609_s7 = inlined_call_operand.vmem [shape: f32[32,4], index: 7, kind: output, shape index: {}]  }
   0x1   :  { %v30_v0 = vld [vmem:[%s602_s1] sm:$0xff]  ;;  %v31_v1 = vld [vmem:[%s602_s1 + $0x8] sm:$0xff]  ;;  %v32_v2 = vld [vmem:[%s602_s1 + $0x10] sm:$0xff] }
   0x2   :  { %v453_v3 = vpack.c.bf16 %v31_v1, %v30_v0  ;;  %v33_v4 = vld [vmem:[%s602_s1 + $0x18] sm:$0xff]  ;;  %v26_v5 = vld [vmem:[%s603_s0] sm:$0xff]  ;;  %v144_v8 = vld [vmem:[%s604_s2 + $0x8] sm:$0xff] }
   0x3   :  { %v457_v6 = vpack.c.bf16 %v33_v4, %v32_v2  ;;  %419 = vmatprep.mubr.msk.f32.mxu0 %vm41_vm0, %v26_v5  ;;  %v143_v7 = vld [vmem:[%s604_s2] sm:$0xff]  ;;  %v27_v10 = vld [vmem:[%s603_s0 + $0x8] sm:$0xff]  ;;  %v28_v11 = vld [vmem:[%s603_s0 + $0x10] sm:$0xff] }
   0x4   :  { %454 = vmatprep.subr.bf16.mxu0 %v453_v3  ;;  %v461_v9 = vpack.c.bf16 %v144_v8, %v143_v7  ;;  %v29_v12 = vld [vmem:[%s603_s0 + $0x18] sm:$0xff]  ;;  %v145_v13 = vld [vmem:[%s604_s2 + $0x10] sm:$0xff]  ;;  %v255_v16 = vld [vmem:[%s605_s3] sm:$0xff] }
   0x5   :  { %456 = vmatpush3.bf16.msra.mxu0 %v453_v3  ;;  %v146_v14 = vld [vmem:[%s604_s2 + $0x18] sm:$0xff]  ;;  %v256_v17 = vld [vmem:[%s605_s3 + $0x8] sm:$0xff]  ;;  %v372_v19 = vld [vmem:[%s606_s4] ss:$0 sm:$0xff] }
   0x6   :  { %458 = vmatprep.subr.bf16.mxu0 %v457_v6  ;;  %462 = vmatprep.subr.bf16.mxu1 %v461_v9  ;;  %v465_v15 = vpack.c.bf16 %v146_v14, %v145_v13  ;;  %v469_v18 = vpack.c.bf16 %v256_v17, %v255_v16  ;;  %v257_v32 = vld [vmem:[%s605_s3 + $0x10] sm:$0xff]  ;;  %v258_v33 = vld [vmem:[%s605_s3 + $0x18] sm:$0xff]  ;;  %v377_v35 = vld [vmem:[%s607_s5] ss:$0 sm:$0xff] }
   0x7   :  { %464 = vmatpush3.bf16.msra.mxu1 %v461_v9  ;;  %v473_v34 = vpack.c.bf16 %v258_v33, %v257_v32  ;;  %v382_v48 = vld [vmem:[%s608_s6] ss:$0 sm:$0xff] }
   0x8   :  { %466 = vmatprep.subr.bf16.mxu1 %v465_v15 }
   0x9   :  { %460 = vmatpush3.bf16.msra.mxu0 %v457_v6 }
   0xa   :  { %470 = vmatprep.subr.bf16.mxu0 %v469_v18 }
   0xb   :  { %468 = vmatpush3.bf16.msra.mxu1 %v465_v15 }
   0xc   :  { %420 = vmatmul.mubr.msk.f32.vlgmr.msra.gmra.mrb[0].mxu0 %vm41_vm0, %v27_v10  ;;  %477 = vmatprep.subr.bf16.mxu1 %v469_v18 }
   0xd   :  { %422 = vmatprep.mubr.msk.f32.mxu0 %vm41_vm0, %v28_v11  ;;  %472 = vmatpush3.bf16.msra.mxu0 %v469_v18 }
   0xe   :  { %474 = vmatprep.subr.bf16.mxu0 %v473_v34 }
  0x10   :  { %423 = vmatmul.mubr.msk.f32.gmra.mrb[2].mxu0 %vm41_vm0, %v29_v12 }
  0x11   :  { %476 = vmatpush3.bf16.msra.mxu0 %v473_v34 }
  0xdf   :  { %v421_v20 = vpop.f32.mrb[0].mxu0 }
  0xe0   :  { %v126_v21 = vadd.f32 %v421_v20, %v372_v19  ;;  %v120_v22 = vpop.f32.mrb[1].mxu0 }
  0xe1   :  { %v121_v23 = vadd.f32 %v372_v19, %v120_v22 }
  0xe2   :  { %v140_v26 = vmax.f32 %v126_v21, 0.0 }
  0xe3   :  { %v139_v24 = vmax.f32 %v121_v23, 0.0  ;;  %v424_v25 = vpop.f32.mrb[2].mxu0 }
  0xe4   :  { %v136_v27 = vadd.f32 %v424_v25, %v372_v19  ;;  %v130_v28 = vpop.f32.mrb[3].mxu0 }
  0xe5   :  { %v131_v29 = vadd.f32 %v372_v19, %v130_v28  ;;  %433 = vmatprep.mubr.msk.f32.mxu1 %vm41_vm0, %v139_v24 }
  0xe6   :  { %434 = vmatmul.mubr.msk.f32.vlgmr.msra.gmra.mrb[0].mxu1 %vm41_vm0, %v140_v26  ;;  %v142_v31 = vmax.f32 %v136_v27, 0.0 }
  0xe7   :  { %v141_v30 = vmax.f32 %v131_v29, 0.0  ;;  %479 = vmatpush3.bf16.msra.mxu1 %v469_v18 }
  0xe8   :  { %478 = vmatprep.subr.bf16.mxu1 %v473_v34 }
  0xe9   :  { %436 = vmatprep.mubr.msk.f32.mxu1 %vm41_vm0, %v141_v30 }
  0xea   :  { %437 = vmatmul.mubr.msk.f32.gmra.mrb[2].mxu1 %vm41_vm0, %v142_v31 }
  0xeb   :  { %480 = vmatpush3.bf16.msra.mxu1 %v473_v34 }
 0x1b9   :  { %v435_v36 = vpop.f32.mrb[0].mxu1 }
 0x1ba   :  { %v238_v37 = vadd.f32 %v435_v36, %v377_v35  ;;  %v232_v38 = vpop.f32.mrb[1].mxu1 }
 0x1bb   :  { %v233_v39 = vadd.f32 %v377_v35, %v232_v38 }
 0x1bc   :  { %v252_v42 = vmax.f32 %v238_v37, 0.0 }
 0x1bd   :  { %v251_v40 = vmax.f32 %v233_v39, 0.0  ;;  %v438_v41 = vpop.f32.mrb[2].mxu1 }
 0x1be   :  { %v248_v43 = vadd.f32 %v438_v41, %v377_v35  ;;  %v242_v44 = vpop.f32.mrb[3].mxu1 }
 0x1bf   :  { %v243_v45 = vadd.f32 %v377_v35, %v242_v44  ;;  %447 = vmatprep.mubr.msk.f32.mxu0 %vm41_vm0, %v251_v40 }
 0x1c0   :  { %448 = vmatmul.mubr.msk.f32.vlgmr.msra.gmra.mrb[4].mxu0 %vm41_vm0, %v252_v42  ;;  %v254_v47 = vmax.f32 %v248_v43, 0.0 }
 0x1c1   :  { %v253_v46 = vmax.f32 %v243_v45, 0.0 }
 0x1c3   :  { %450 = vmatprep.mubr.msk.f32.mxu1 %vm41_vm0, %v253_v46 }
 0x1c4   :  { %451 = vmatmul.mubr.msk.f32.vlgmr.msra.gmra.mrb[4].mxu1 %vm41_vm0, %v254_v47 }
 0x293   :  { %v449_v49 = vpop.f32.mrb[4].mxu0 }
 0x294   :  { %v350_v50 = vadd.f32 %v449_v49, %v382_v48  ;;  %v344_v51 = vpop.f32.mrb[5].mxu0 }
 0x295   :  { %v345_v52 = vadd.f32 %v382_v48, %v344_v51 }
 0x296   :  { %365 = vst.msk [vmem:[%s609_s7 + $0x8] sm:$0xff] %vm363_vm1, %v350_v50 }
 0x297   :  { %364 = vst.msk [vmem:[%s609_s7] sm:$0xff] %vm363_vm1, %v345_v52  ;;  %v452_v53 = vpop.f32.mrb[4].mxu1 }
 0x298   :  { %v360_v54 = vadd.f32 %v452_v53, %v382_v48  ;;  %v354_v55 = vpop.f32.mrb[5].mxu1 }
 0x299   :  { %v355_v56 = vadd.f32 %v382_v48, %v354_v55 }
 0x29a   :  { %367 = vst.msk [vmem:[%s609_s7 + $0x18] sm:$0xff] %vm363_vm1, %v360_v54 }
 0x29b   :  { %366 = vst.msk [vmem:[%s609_s7 + $0x10] sm:$0xff] %vm363_vm1, %v355_v56 }

</bundles_post_ra>
